<compile_context>
chip_gen: v7x
topology: tpu7x:2x2x1
jax: 0.10.0
libtpu: 0.0.40
codegen_flags: <defaults>
</compile_context>

<pallas_src>
import jax
import jax.numpy as jnp
from jax import lax
from jax.experimental import pallas as pl
from jax.experimental.pallas import tpu as pltpu


def _round_up(x, m):
    return (x + m - 1) // m * m


def _pick_tile(dim, candidates):
    """Largest candidate that evenly divides `dim` (candidates sorted desc)."""
    for c in candidates:
        if dim >= c and dim % c == 0:
            return c
    return dim


# ---------------------------------------------------------------------------
# Kernel 1: the strictly-serial recurrence.
#   x_ref   : (seq*batch_p, hidden_p)  = W_ih^T[tok] + (b_ih + b_hh), time-major
#   whhT_ref: (hidden_p, hidden_p)     = W_hh^T (padded)
#   h0_ref  : (batch_p, hidden_p)
#   hs_ref  : (seq*batch_p, hidden_p)  all hidden states (output, feeds the head)
#   hfin_ref: (batch_p, hidden_p)      final hidden state
# ---------------------------------------------------------------------------
def _recurrence_kernel(x_ref, whhT_ref, h0_ref, hs_ref, hfin_ref):
    batch_p = h0_ref.shape[0]
    seq = x_ref.shape[0] // batch_p

    whhT = whhT_ref[...]          # stationary across the whole recurrence

    def step(t, h_prev):
        base = pl.multiple_of(t * batch_p, batch_p)
        x_t = x_ref[pl.ds(base, batch_p), :]        # single aligned (8,128) load
        h_new = jnp.tanh(
            x_t + jnp.dot(h_prev, whhT, preferred_element_type=jnp.float32))
        hs_ref[pl.ds(base, batch_p), :] = h_new
        return h_new

    # Bounded unroll: hides MXU latency without vreg / code-size blowup.
    h_final = lax.fori_loop(0, seq, step, h0_ref[...], unroll=min(seq, 8))
    hfin_ref[...] = h_final


# ---------------------------------------------------------------------------
# Kernel 2: the vocab head — lane-dense (M, N)-tiled matmul + bias.
#   h_ref    : (tm, hidden_p)
#   wlinT_ref: (hidden_p, tn)
#   blin_ref : (1, tn)
#   out_ref  : (tm, tn)
# ---------------------------------------------------------------------------
def _head_kernel(h_ref, wlinT_ref, blin_ref, out_ref):
    out_ref[...] = (
        jnp.dot(h_ref[...], wlinT_ref[...], preferred_element_type=jnp.float32)
        + blin_ref[...])


def rnn_model_forward(xb, state, params):
    """xb: (batch, seq) int tokens; state: (1, batch, hidden) f32."""
    w_ih, w_hh, b_ih, b_hh, w_lin, b_lin = (
        params["w_ih"], params["w_hh"], params["b_ih"], params["b_hh"],
        params["w_lin"], params["b_lin"])
    hidden, vocab = w_ih.shape
    batch, seq = xb.shape
    f32 = jnp.float32

    hidden_p = _round_up(hidden, 128)
    vocab_p = _round_up(vocab, 128)
    batch_p = _round_up(batch, 8)
    m_rows = seq * batch_p

    # --- one-time weight prep (outside the hot loop; pads only when needed) ---
    embT = w_ih.T.astype(f32)                                     # (vocab, hidden)
    if hidden_p != hidden:
        embT = jnp.zeros((vocab, hidden_p), f32).at[:, :hidden].set(embT)

    whhT = w_hh.T.astype(f32)
    if hidden_p != hidden:
        whhT = jnp.zeros((hidden_p, hidden_p), f32).at[:hidden, :hidden].set(w_hh.T)

    wlinT = w_lin.T.astype(f32)                                   # (hidden, vocab)
    if hidden_p != hidden or vocab_p != vocab:
        wlinT = jnp.zeros((hidden_p, vocab_p), f32).at[:hidden, :vocab].set(w_lin.T)

    bias = (b_ih + b_hh).astype(f32)
    if hidden_p != hidden:
        bias = jnp.zeros((hidden_p,), f32).at[:hidden].set(b_ih + b_hh)

    blin = b_lin.astype(f32)
    if vocab_p != vocab:
        blin = jnp.zeros((vocab_p,), f32).at[:vocab].set(b_lin)
    blin = blin.reshape(1, vocab_p)

    h0 = state[0].astype(f32)
    if batch_p != batch or hidden_p != hidden:
        h0 = jnp.zeros((batch_p, hidden_p), f32).at[:batch, :hidden].set(state[0])

    # --- hoisted embedding gather + bias fold (off the serial chain) ---
    tok = xb.T.astype(jnp.int32)                                  # (seq, batch), time-major
    if batch_p != batch:
        tok = jnp.zeros((seq, batch_p), jnp.int32).at[:, :batch].set(tok)
    x_all = embT[tok.reshape(-1)] + bias[None, :]                 # (seq*batch_p, hidden_p)

    # --- call 1: the recurrence (single invocation; inherently serial) ---
    hs, hfin = pl.pallas_call(
        _recurrence_kernel,
        out_shape=(
            jax.ShapeDtypeStruct((m_rows, hidden_p), f32),        # all hidden states
            jax.ShapeDtypeStruct((batch_p, hidden_p), f32),       # final hidden state
        ),
        in_specs=[
            pl.BlockSpec(memory_space=pltpu.MemorySpace.VMEM),    # x_all
            pl.BlockSpec(memory_space=pltpu.MemorySpace.VMEM),    # W_hh^T
            pl.BlockSpec(memory_space=pltpu.MemorySpace.VMEM),    # h0
        ],
        out_specs=(
            pl.BlockSpec(memory_space=pltpu.MemorySpace.VMEM),
            pl.BlockSpec(memory_space=pltpu.MemorySpace.VMEM),
        ),
    )(x_all, whhT, h0)

    # --- call 2: the vocab head, tiled over (M, N) and megacore-parallel ---
    tm = _pick_tile(m_rows, (512, 256, 128, 64, 32, 16, 8))
    tn = _pick_tile(vocab_p, (512, 256, 128))
    grid = (m_rows // tm, vocab_p // tn)
    # Note: set pltpu.CompilerParams(vmem_limit_bytes=...) once tiles grow past
    # the 16/32 MiB scoped defaults; unnecessary at these toy shapes.

    out_p = pl.pallas_call(
        _head_kernel,
        out_shape=jax.ShapeDtypeStruct((m_rows, vocab_p), f32),
        grid=grid,
        in_specs=[
            pl.BlockSpec((tm, hidden_p), lambda i, j: (i, 0)),    # hidden states
            pl.BlockSpec((hidden_p, tn), lambda i, j: (0, j)),    # W_lin^T
            pl.BlockSpec((1, tn), lambda i, j: (0, j)),           # b_lin
        ],
        out_specs=pl.BlockSpec((tm, tn), lambda i, j: (i, j)),
        compiler_params=pltpu.CompilerParams(
            dimension_semantics=("parallel", "parallel")),
    )(hs, wlinT, blin)

    # --- strip padding (skipped entirely when shapes are already aligned) ---
    if batch_p == batch and vocab_p == vocab:
        out = out_p.reshape(seq * batch, vocab)
    else:
        out = (out_p.reshape(seq, batch_p, vocab_p)[:, :batch, :vocab]
               .reshape(seq * batch, vocab))

    if batch_p == batch and hidden_p == hidden:
        new_state = hfin[None]
    else:
        new_state = hfin[:batch, :hidden][None]
    return out, new_state


def _reference(xb, state, params):
    """Pure-JAX reference (mathematically identical to PyTorch's one-hot RNN)."""
    w_ih, w_hh, b_ih, b_hh, w_lin, b_lin = (
        params["w_ih"], params["w_hh"], params["b_ih"], params["b_hh"],
        params["w_lin"], params["b_lin"])
    emb = w_ih.T                              # one_hot(t) @ W_ih^T == W_ih^T[t]
    xt = xb.T                                 # (seq, batch)
    h = state[0]
    ys = []
    for t in range(xt.shape[0]):
        x_t = emb[xt[t]]                      # (batch, hidden)
        h = jnp.tanh(x_t + h @ w_hh.T + (b_ih + b_hh))
        ys.append(h)
    yb = jnp.stack(ys, axis=0).reshape(-1, h.shape[-1])
    out = yb @ w_lin.T + b_lin
    return out, h[None]


if __name__ == "__main__":
    vocab_size = 32
    hidden_size = 32
    batch = 2
    seq = 8

    key = jax.random.PRNGKey(0)
    ks = jax.random.split(key, 7)
    bound = 1.0 / (hidden_size ** 0.5)
    params = {
        "w_ih": jax.random.uniform(ks[0], (hidden_size, vocab_size),
                                   minval=-bound, maxval=bound, dtype=jnp.float32),
        "w_hh": jax.random.uniform(ks[1], (hidden_size, hidden_size),
                                   minval=-bound, maxval=bound, dtype=jnp.float32),
        "b_ih": jax.random.uniform(ks[2], (hidden_size,),
                                   minval=-bound, maxval=bound, dtype=jnp.float32),
        "b_hh": jax.random.uniform(ks[3], (hidden_size,),
                                   minval=-bound, maxval=bound, dtype=jnp.float32),
        "w_lin": jax.random.uniform(ks[4], (vocab_size, hidden_size),
                                    minval=-bound, maxval=bound, dtype=jnp.float32),
        "b_lin": jax.random.uniform(ks[5], (vocab_size,),
                                    minval=-bound, maxval=bound, dtype=jnp.float32),
    }

    xb = jax.random.randint(ks[6], (batch, seq), 0, vocab_size, dtype=jnp.int32)
    state0 = jnp.zeros((1, batch, hidden_size), dtype=jnp.float32)   # begin_state

    out, new_state = rnn_model_forward(xb, state0, params)
    jax.block_until_ready((out, new_state))

    ref_out, ref_state = _reference(xb, state0, params)
    assert out.shape == (seq * batch, vocab_size)
    assert new_state.shape == (1, batch, hidden_size)
    assert jnp.allclose(out, ref_out, atol=5e-5, rtol=5e-5)
    assert jnp.allclose(new_state, ref_state, atol=5e-5, rtol=5e-5)

    print("KERNEL_OK")
</pallas_src>

<mosaic_0001>
module attributes {stable_mosaic.version = 11 : i64} {
  func.func @_recurrence_kernel(%arg0: memref<64x128xf32, #tpu.memory_space<vmem>>, %arg1: memref<128x128xf32, #tpu.memory_space<vmem>>, %arg2: memref<8x128xf32, #tpu.memory_space<vmem>>, %arg3: memref<64x128xf32, #tpu.memory_space<vmem>>, %arg4: memref<8x128xf32, #tpu.memory_space<vmem>>) attributes {dimension_semantics = [], scalar_prefetch = 0 : i64, scratch_operands = 0 : i64, tpu.core_type = #tpu.core_type<tc>} {
    %c0 = arith.constant 0 : index
    %c0_0 = arith.constant 0 : index
    %0 = vector.load %arg1[%c0, %c0_0] : memref<128x128xf32, #tpu.memory_space<vmem>>, vector<128x128xf32>
    %c0_1 = arith.constant 0 : index
    %c0_2 = arith.constant 0 : index
    %1 = vector.load %arg2[%c0_1, %c0_2] : memref<8x128xf32, #tpu.memory_space<vmem>>, vector<8x128xf32>
    %c0_i32 = arith.constant 0 : i32
    %c8_i32 = arith.constant 8 : i32
    %2 = arith.muli %c0_i32, %c8_i32 : i32
    %3 = tpu.assume_multiple %2, 8 : i32
    %4 = arith.index_cast %3 : i32 to index
    %c0_3 = arith.constant 0 : index
    %5 = vector.load %arg0[%4, %c0_3] : memref<64x128xf32, #tpu.memory_space<vmem>>, vector<8x128xf32>
    %cst = arith.constant dense<0.000000e+00> : vector<8x128xf32>
    %6 = tpu.matmul %1, %0, %cst {dimension_numbers = #tpu.dot_dimension_numbers<[1], [0], [0], [1], [0, 0, 1, 1], [], []>} : vector<8x128xf32>, vector<128x128xf32>, vector<8x128xf32> -> vector<8x128xf32>
    %7 = arith.addf %5, %6 : vector<8x128xf32>
    %8 = math.tanh %7 : vector<8x128xf32>
    %9 = arith.index_cast %3 : i32 to index
    %c0_4 = arith.constant 0 : index
    %10 = vector.load %arg3[%9, %c0_4] : memref<64x128xf32, #tpu.memory_space<vmem>>, vector<8x128xf32>
    tpu.vector_store %arg3[%9, %c0_4], %8 {strides = array<i32>} : memref<64x128xf32, #tpu.memory_space<vmem>>, vector<8x128xf32>,
    %c1_i32 = arith.constant 1 : i32
    %c8_i32_5 = arith.constant 8 : i32
    %11 = arith.muli %c1_i32, %c8_i32_5 : i32
    %12 = tpu.assume_multiple %11, 8 : i32
    %13 = arith.index_cast %12 : i32 to index
    %c0_6 = arith.constant 0 : index
    %14 = vector.load %arg0[%13, %c0_6] : memref<64x128xf32, #tpu.memory_space<vmem>>, vector<8x128xf32>
    %cst_7 = arith.constant dense<0.000000e+00> : vector<8x128xf32>
    %15 = tpu.matmul %8, %0, %cst_7 {dimension_numbers = #tpu.dot_dimension_numbers<[1], [0], [0], [1], [0, 0, 1, 1], [], []>} : vector<8x128xf32>, vector<128x128xf32>, vector<8x128xf32> -> vector<8x128xf32>
    %16 = arith.addf %14, %15 : vector<8x128xf32>
    %17 = math.tanh %16 : vector<8x128xf32>
    %18 = arith.index_cast %12 : i32 to index
    %c0_8 = arith.constant 0 : index
    %19 = vector.load %arg3[%18, %c0_8] : memref<64x128xf32, #tpu.memory_space<vmem>>, vector<8x128xf32>
    tpu.vector_store %arg3[%18, %c0_8], %17 {strides = array<i32>} : memref<64x128xf32, #tpu.memory_space<vmem>>, vector<8x128xf32>,
    %c2_i32 = arith.constant 2 : i32
    %c8_i32_9 = arith.constant 8 : i32
    %20 = arith.muli %c2_i32, %c8_i32_9 : i32
    %21 = tpu.assume_multiple %20, 8 : i32
    %22 = arith.index_cast %21 : i32 to index
    %c0_10 = arith.constant 0 : index
    %23 = vector.load %arg0[%22, %c0_10] : memref<64x128xf32, #tpu.memory_space<vmem>>, vector<8x128xf32>
    %cst_11 = arith.constant dense<0.000000e+00> : vector<8x128xf32>
    %24 = tpu.matmul %17, %0, %cst_11 {dimension_numbers = #tpu.dot_dimension_numbers<[1], [0], [0], [1], [0, 0, 1, 1], [], []>} : vector<8x128xf32>, vector<128x128xf32>, vector<8x128xf32> -> vector<8x128xf32>
    %25 = arith.addf %23, %24 : vector<8x128xf32>
    %26 = math.tanh %25 : vector<8x128xf32>
    %27 = arith.index_cast %21 : i32 to index
    %c0_12 = arith.constant 0 : index
    %28 = vector.load %arg3[%27, %c0_12] : memref<64x128xf32, #tpu.memory_space<vmem>>, vector<8x128xf32>
    tpu.vector_store %arg3[%27, %c0_12], %26 {strides = array<i32>} : memref<64x128xf32, #tpu.memory_space<vmem>>, vector<8x128xf32>,
    %c3_i32 = arith.constant 3 : i32
    %c8_i32_13 = arith.constant 8 : i32
    %29 = arith.muli %c3_i32, %c8_i32_13 : i32
    %30 = tpu.assume_multiple %29, 8 : i32
    %31 = arith.index_cast %30 : i32 to index
    %c0_14 = arith.constant 0 : index
    %32 = vector.load %arg0[%31, %c0_14] : memref<64x128xf32, #tpu.memory_space<vmem>>, vector<8x128xf32>
    %cst_15 = arith.constant dense<0.000000e+00> : vector<8x128xf32>
    %33 = tpu.matmul %26, %0, %cst_15 {dimension_numbers = #tpu.dot_dimension_numbers<[1], [0], [0], [1], [0, 0, 1, 1], [], []>} : vector<8x128xf32>, vector<128x128xf32>, vector<8x128xf32> -> vector<8x128xf32>
    %34 = arith.addf %32, %33 : vector<8x128xf32>
    %35 = math.tanh %34 : vector<8x128xf32>
    %36 = arith.index_cast %30 : i32 to index
    %c0_16 = arith.constant 0 : index
    %37 = vector.load %arg3[%36, %c0_16] : memref<64x128xf32, #tpu.memory_space<vmem>>, vector<8x128xf32>
    tpu.vector_store %arg3[%36, %c0_16], %35 {strides = array<i32>} : memref<64x128xf32, #tpu.memory_space<vmem>>, vector<8x128xf32>,
    %c4_i32 = arith.constant 4 : i32
    %c8_i32_17 = arith.constant 8 : i32
    %38 = arith.muli %c4_i32, %c8_i32_17 : i32
    %39 = tpu.assume_multiple %38, 8 : i32
    %40 = arith.index_cast %39 : i32 to index
    %c0_18 = arith.constant 0 : index
    %41 = vector.load %arg0[%40, %c0_18] : memref<64x128xf32, #tpu.memory_space<vmem>>, vector<8x128xf32>
    %cst_19 = arith.constant dense<0.000000e+00> : vector<8x128xf32>
    %42 = tpu.matmul %35, %0, %cst_19 {dimension_numbers = #tpu.dot_dimension_numbers<[1], [0], [0], [1], [0, 0, 1, 1], [], []>} : vector<8x128xf32>, vector<128x128xf32>, vector<8x128xf32> -> vector<8x128xf32>
    %43 = arith.addf %41, %42 : vector<8x128xf32>
    %44 = math.tanh %43 : vector<8x128xf32>
    %45 = arith.index_cast %39 : i32 to index
    %c0_20 = arith.constant 0 : index
    %46 = vector.load %arg3[%45, %c0_20] : memref<64x128xf32, #tpu.memory_space<vmem>>, vector<8x128xf32>
    tpu.vector_store %arg3[%45, %c0_20], %44 {strides = array<i32>} : memref<64x128xf32, #tpu.memory_space<vmem>>, vector<8x128xf32>,
    %c5_i32 = arith.constant 5 : i32
    %c8_i32_21 = arith.constant 8 : i32
    %47 = arith.muli %c5_i32, %c8_i32_21 : i32
    %48 = tpu.assume_multiple %47, 8 : i32
    %49 = arith.index_cast %48 : i32 to index
    %c0_22 = arith.constant 0 : index
    %50 = vector.load %arg0[%49, %c0_22] : memref<64x128xf32, #tpu.memory_space<vmem>>, vector<8x128xf32>
    %cst_23 = arith.constant dense<0.000000e+00> : vector<8x128xf32>
    %51 = tpu.matmul %44, %0, %cst_23 {dimension_numbers = #tpu.dot_dimension_numbers<[1], [0], [0], [1], [0, 0, 1, 1], [], []>} : vector<8x128xf32>, vector<128x128xf32>, vector<8x128xf32> -> vector<8x128xf32>
    %52 = arith.addf %50, %51 : vector<8x128xf32>
    %53 = math.tanh %52 : vector<8x128xf32>
    %54 = arith.index_cast %48 : i32 to index
    %c0_24 = arith.constant 0 : index
    %55 = vector.load %arg3[%54, %c0_24] : memref<64x128xf32, #tpu.memory_space<vmem>>, vector<8x128xf32>
    tpu.vector_store %arg3[%54, %c0_24], %53 {strides = array<i32>} : memref<64x128xf32, #tpu.memory_space<vmem>>, vector<8x128xf32>,
    %c6_i32 = arith.constant 6 : i32
    %c8_i32_25 = arith.constant 8 : i32
    %56 = arith.muli %c6_i32, %c8_i32_25 : i32
    %57 = tpu.assume_multiple %56, 8 : i32
    %58 = arith.index_cast %57 : i32 to index
    %c0_26 = arith.constant 0 : index
    %59 = vector.load %arg0[%58, %c0_26] : memref<64x128xf32, #tpu.memory_space<vmem>>, vector<8x128xf32>
    %cst_27 = arith.constant dense<0.000000e+00> : vector<8x128xf32>
    %60 = tpu.matmul %53, %0, %cst_27 {dimension_numbers = #tpu.dot_dimension_numbers<[1], [0], [0], [1], [0, 0, 1, 1], [], []>} : vector<8x128xf32>, vector<128x128xf32>, vector<8x128xf32> -> vector<8x128xf32>
    %61 = arith.addf %59, %60 : vector<8x128xf32>
    %62 = math.tanh %61 : vector<8x128xf32>
    %63 = arith.index_cast %57 : i32 to index
    %c0_28 = arith.constant 0 : index
    %64 = vector.load %arg3[%63, %c0_28] : memref<64x128xf32, #tpu.memory_space<vmem>>, vector<8x128xf32>
    tpu.vector_store %arg3[%63, %c0_28], %62 {strides = array<i32>} : memref<64x128xf32, #tpu.memory_space<vmem>>, vector<8x128xf32>,
    %c7_i32 = arith.constant 7 : i32
    %c8_i32_29 = arith.constant 8 : i32
    %65 = arith.muli %c7_i32, %c8_i32_29 : i32
    %66 = tpu.assume_multiple %65, 8 : i32
    %67 = arith.index_cast %66 : i32 to index
    %c0_30 = arith.constant 0 : index
    %68 = vector.load %arg0[%67, %c0_30] : memref<64x128xf32, #tpu.memory_space<vmem>>, vector<8x128xf32>
    %cst_31 = arith.constant dense<0.000000e+00> : vector<8x128xf32>
    %69 = tpu.matmul %62, %0, %cst_31 {dimension_numbers = #tpu.dot_dimension_numbers<[1], [0], [0], [1], [0, 0, 1, 1], [], []>} : vector<8x128xf32>, vector<128x128xf32>, vector<8x128xf32> -> vector<8x128xf32>
    %70 = arith.addf %68, %69 : vector<8x128xf32>
    %71 = math.tanh %70 : vector<8x128xf32>
    %72 = arith.index_cast %66 : i32 to index
    %c0_32 = arith.constant 0 : index
    %73 = vector.load %arg3[%72, %c0_32] : memref<64x128xf32, #tpu.memory_space<vmem>>, vector<8x128xf32>
    tpu.vector_store %arg3[%72, %c0_32], %71 {strides = array<i32>} : memref<64x128xf32, #tpu.memory_space<vmem>>, vector<8x128xf32>,
    %c8_i32_33 = arith.constant 8 : i32
    %c0_34 = arith.constant 0 : index
    %c0_35 = arith.constant 0 : index
    %74 = vector.load %arg4[%c0_34, %c0_35] : memref<8x128xf32, #tpu.memory_space<vmem>>, vector<8x128xf32>
    tpu.vector_store %arg4[%c0_34, %c0_35], %71 {strides = array<i32>} : memref<8x128xf32, #tpu.memory_space<vmem>>, vector<8x128xf32>,
    return
  }
}

</mosaic_0001>

<bundles_post_ra>
// kernel: tpu_custom_call.1
= control target key start
LH: loop header
LB: loop body
LE: loop exit
PB: predicated region body
PF: predicated region fallthrough
CT: control target
= control target key end

     0   :  { %10 = vsyncpa [#allocation3], 0  ;;  %s1736_s0 = inlined_call_operand.hbm [shape: f32[64,128], index: 0, kind: input, shape index: {}]   ;;  %s1737_s1 = inlined_call_operand.hbm [shape: f32[128,128], index: 1, kind: input, shape index: {}]   ;;  %s1738_s2 = inlined_call_operand.hbm [shape: f32[8,128], index: 2, kind: input, shape index: {}]   ;;  %s1739_s3 = inlined_call_operand.hbm [shape: f32[64,128], index: 3, kind: output, shape index: {0}]   ;;  %s1740_s4 = inlined_call_operand.hbm [shape: f32[8,128], index: 4, kind: output, shape index: {1}]  }
   0x1   :  { %11 = vsyncpa [#allocation6], 0 }
   0x2   :  { %12 = vsyncpa [#allocation4], 0 }
   0x3   :  { %13 = vsyncpa [#allocation10], 0  ;;  %s1465_s15 = smov [#allocation5]   ;;  %s1466_s17 = smov [#allocation2]  }
   0x4   :  { %s31_s16 = sshll.u32 %s1465_s15, 4  ;;  %s19_s18 = sshll.u32 %s1466_s17, 4  ;;  %s32_s16 = int_to_ptr.vmem [resolvable:$true] %s31_s16  ;;  %s1500_s18 = int_to_ptr.vmem [resolvable:$true] %s19_s18 }
   0x5   :  { %s1347_s21 = scalar_lea.hbm %s1737_s1, 2048 }
   0x6   :  { %p1348_p0 = scmp.ne.s32.totalorder %s1737_s1, %s1347_s21  ;;  %p1351_p1 = scmp.lt.u32.totalorder %s1347_s21, %s1737_s1 }
   0x8   :  { %p1353_p2 = pnand %p1351_p1, %p1348_p0 }
   0xa   :  { %1356 = shalt.err (!%p1353_p2)
}
   0xb   :  { %s1357_s26 = scalar_lea.vmem %s32_s16, 2048  ;;  %p1362_p4 = scmp.lt.s32.totalorder %s32_s16, %s32_s16 }
   0xc   :  { %p1358_p3 = scmp.ne.s32.totalorder %s32_s16, %s1357_s26  ;;  %p1363_p5 = scmp.lt.s32.totalorder %s1357_s26, %s1357_s26 }
   0xe   :  { %p1364_p6 = por %p1363_p5, %p1362_p4 }
  0x10   :  { %p1365_p7 = pnand %p1364_p6, %p1358_p3 }
  0x12   :  { %1368 = shalt.err (!%p1365_p7)
}
  0x13   :  { %s1467_s27 = smov 128   ;;  %s1468_s28 = smov 8  }
  0x14   :  { %37 = dma.hbm_to_vmem [thread:$0]  %s1737_s1, 2048, %s32_s16, [#allocation6], %s1467_s27, %s1467_s27, %s1468_s28  }
  0x15   :  { %s1369_s7 = scalar_lea.hbm %s1736_s0, 1024 }
  0x16   :  { %p1370_p8 = scmp.ne.s32.totalorder %s1736_s0, %s1369_s7  ;;  %p1373_p9 = scmp.lt.u32.totalorder %s1369_s7, %s1736_s0 }
  0x18   :  { %p1375_p10 = pnand %p1373_p9, %p1370_p8 }
  0x1a   :  { %1378 = shalt.err (!%p1375_p10)
}
  0x1b   :  { %s1379_s12 = scalar_lea.vmem %s1500_s18, 1024  ;;  %p1384_p12 = scmp.lt.s32.totalorder %s1500_s18, %s1500_s18 }
  0x1c   :  { %p1380_p11 = scmp.ne.s32.totalorder %s1500_s18, %s1379_s12  ;;  %p1385_p13 = scmp.lt.s32.totalorder %s1379_s12, %s1379_s12 }
  0x1e   :  { %p1386_p0 = por %p1385_p13, %p1384_p12 }
  0x20   :  { %p1387_p1 = pnand %p1386_p0, %p1380_p11 }
  0x22   :  { %1390 = shalt.err (!%p1387_p1)
}
  0x23   :  { %25 = dma.hbm_to_vmem [thread:$0]  %s1736_s0, 1024, %s1500_s18, [#allocation3], %s1467_s27, %s1467_s27, %s1468_s28  }
  0x24   :  { %s1469_s14 = smov [#allocation7]   ;;  %s1391_s19 = scalar_lea.hbm %s1738_s2, 128 }
  0x25   :  { %s44_s15 = sshll.u32 %s1469_s14, 4  ;;  %p1392_p2 = scmp.ne.s32.totalorder %s1738_s2, %s1391_s19  ;;  %s45_s15 = int_to_ptr.vmem [resolvable:$true] %s44_s15 }
  0x26   :  { %p1395_p3 = scmp.lt.u32.totalorder %s1391_s19, %s1738_s2 }
  0x28   :  { %p1397_p4 = pnand %p1395_p3, %p1392_p2 }
  0x2a   :  { %1400 = shalt.err (!%p1397_p4)
}
  0x2b   :  { %s1401_s24 = scalar_lea.vmem %s45_s15, 128  ;;  %p1406_p6 = scmp.lt.s32.totalorder %s45_s15, %s45_s15 }
  0x2c   :  { %p1402_p5 = scmp.ne.s32.totalorder %s45_s15, %s1401_s24  ;;  %p1407_p7 = scmp.lt.s32.totalorder %s1401_s24, %s1401_s24 }
  0x2e   :  { %p1408_p8 = por %p1407_p7, %p1406_p6 }
  0x30   :  { %p1409_p9 = pnand %p1408_p8, %p1402_p5 }
  0x32   :  { %1412 = shalt.err (!%p1409_p9)
}
  0x33   :  { %47 = dma.hbm_to_vmem [thread:$0]  %s1738_s2, 128, %s45_s15, [#allocation6]  }
  0x34   :  { %1457 = dma.done.wait [#allocation3], 1024  }
  0x35   :  { %1458 = vsyncadd [#allocation3], 4294966272 }
  0x36   :  { %1459 = dma.done.wait [#allocation6], 2176  }
  0x37   :  { %1460 = vsyncadd [#allocation6], 4294965120  ;;  %v1470_v0 = vmov 0.0|0.0   ;;  %vm1471_vm0 = vmmov 0   ;;  %v1472_v1 = vmov 0.0   ;;  %v57_v2 = vld [vmem:[#allocation5] sm:$0xff] }
  0x38   :  { %1129 = vmatprep.subr.bf16.mxu0 %v1470_v0  ;;  %881 = vmatprep.mubr.msk.f32.mxu0 %vm1471_vm0, %v1472_v1  ;;  %v58_v3 = vld [vmem:[#allocation5 + $0x8] sm:$0xff]  ;;  %v59_v4 = vld [vmem:[#allocation5 + $0x10] sm:$0xff]  ;;  %v60_v6 = vld [vmem:[#allocation5 + $0x18] sm:$0xff]  ;;  %s1473_s2 = smov [#allocation8]   ;;  %s1474_s26 = smov [#allocation9]  }
  0x39   :  { %1153 = vmatprep.subr.bf16.mxu1 %v1470_v0  ;;  %916 = vmatprep.mubr.msk.f32.mxu1 %vm1471_vm0, %v1472_v1  ;;  %v1555_v5 = vpack.c.bf16 %v58_v3, %v57_v2  ;;  %v1558_v7 = vpack.c.bf16 %v60_v6, %v59_v4  ;;  %v61_v8 = vld [vmem:[#allocation5 + $0x20] sm:$0xff]  ;;  %v62_v9 = vld [vmem:[#allocation5 + $0x28] sm:$0xff]  ;;  %v63_v11 = vld [vmem:[#allocation5 + $0x30] sm:$0xff]  ;;  %s686_s25 = sshll.u32 %s1473_s2, 4  ;;  %s699_s29 = sshll.u32 %s1474_s26, 4  ;;  %s687_s25 = int_to_ptr.vmem [resolvable:$true] %s686_s25  ;;  %s700_s29 = int_to_ptr.vmem [resolvable:$true] %s699_s29 }
  0x3a   :  { %v1564_v10 = vpack.c.bf16 %v62_v9, %v61_v8  ;;  %v64_v12 = vld [vmem:[#allocation5 + $0x38] sm:$0xff]  ;;  %v65_v14 = vld [vmem:[#allocation5 + $0x40] sm:$0xff]  ;;  %v66_v15 = vld [vmem:[#allocation5 + $0x48] sm:$0xff]  ;;  %s1413_s30 = scalar_lea.vmem %s687_s25, 1024  ;;  %p1418_p11 = scmp.lt.s32.totalorder %s687_s25, %s687_s25 }
  0x3b   :  { %1131 = vmatpush3.bf16.msra.mxu0 %v1555_v5  ;;  %1155 = vmatpush3.bf16.msra.mxu1 %v1555_v5  ;;  %v1570_v13 = vpack.c.bf16 %v64_v12, %v63_v11  ;;  %v1576_v16 = vpack.c.bf16 %v66_v15, %v65_v14  ;;  %v67_v17 = vld [vmem:[#allocation5 + $0x50] sm:$0xff]  ;;  %v68_v18 = vld [vmem:[#allocation5 + $0x58] sm:$0xff]  ;;  %v69_v20 = vld [vmem:[#allocation5 + $0x60] sm:$0xff]  ;;  %p1414_p10 = scmp.ne.s32.totalorder %s687_s25, %s1413_s30  ;;  %p1419_p12 = scmp.lt.s32.totalorder %s1413_s30, %s1413_s30 }
  0x3c   :  { %1132 = vmatprep.subr.bf16.mxu0 %v1470_v0  ;;  %1156 = vmatprep.subr.bf16.mxu1 %v1470_v0  ;;  %v1582_v19 = vpack.c.bf16 %v68_v18, %v67_v17  ;;  %v70_v21 = vld [vmem:[#allocation5 + $0x68] sm:$0xff]  ;;  %v71_v23 = vld [vmem:[#allocation5 + $0x70] sm:$0xff]  ;;  %v72_v24 = vld [vmem:[#allocation5 + $0x78] sm:$0xff] }
  0x3d   :  { %v1588_v22 = vpack.c.bf16 %v70_v21, %v69_v20  ;;  %v1594_v25 = vpack.c.bf16 %v72_v24, %v71_v23  ;;  %v73_v26 = vld [vmem:[#allocation7] sm:$0xff]  ;;  %v149_v32 = vld [vmem:[#allocation2 + $0x8] sm:$0xff]  ;;  %v225_v37 = vld [vmem:[#allocation2 + $0x10] sm:$0xff]  ;;  %p1420_p13 = por %p1419_p12, %p1418_p11 }
  0x3e   :  { %v74_v27 = vld [vmem:[#allocation2] sm:$0xff]  ;;  %v301_v42 = vld [vmem:[#allocation2 + $0x18] sm:$0xff]  ;;  %v453_v52 = vld [vmem:[#allocation2 + $0x28] sm:$0xff] }
  0x3f   :  { %1134 = vmatpush3.bf16.msra.mxu0 %v1558_v7  ;;  %1158 = vmatpush3.bf16.msra.mxu1 %v1558_v7  ;;  %v377_v47 = vld [vmem:[#allocation2 + $0x20] sm:$0xff]  ;;  %v529_v57 = vld [vmem:[#allocation2 + $0x30] sm:$0xff]  ;;  %v605_v62 = vld [vmem:[#allocation2 + $0x38] sm:$0xff]  ;;  %p1421_p0 = pnand %p1420_p13, %p1414_p10 }
  0x40   :  { %1135 = vmatprep.subr.bf16.mxu0 %v1470_v0  ;;  %1159 = vmatprep.subr.bf16.mxu1 %v1470_v0 }
  0x43   :  { %1137 = vmatpush3.bf16.msra.mxu0 %v1564_v10  ;;  %1161 = vmatpush3.bf16.msra.mxu1 %v1564_v10 }
  0x44   :  { %1138 = vmatprep.subr.bf16.mxu0 %v1470_v0  ;;  %1162 = vmatprep.subr.bf16.mxu1 %v1470_v0 }
  0x47   :  { %1140 = vmatpush3.bf16.msra.mxu0 %v1570_v13  ;;  %1164 = vmatpush3.bf16.msra.mxu1 %v1570_v13 }
  0x48   :  { %1141 = vmatprep.subr.bf16.mxu0 %v1470_v0  ;;  %1165 = vmatprep.subr.bf16.mxu1 %v1470_v0 }
  0x4b   :  { %1143 = vmatpush3.bf16.msra.mxu0 %v1576_v16  ;;  %1167 = vmatpush3.bf16.msra.mxu1 %v1576_v16 }
  0x4c   :  { %1144 = vmatprep.subr.bf16.mxu0 %v1470_v0  ;;  %1168 = vmatprep.subr.bf16.mxu1 %v1470_v0 }
  0x4f   :  { %1146 = vmatpush3.bf16.msra.mxu0 %v1582_v19  ;;  %1170 = vmatpush3.bf16.msra.mxu1 %v1582_v19 }
  0x50   :  { %1147 = vmatprep.subr.bf16.mxu0 %v1470_v0  ;;  %1171 = vmatprep.subr.bf16.mxu1 %v1470_v0 }
  0x53   :  { %1149 = vmatpush3.bf16.msra.mxu0 %v1588_v22  ;;  %1173 = vmatpush3.bf16.msra.mxu1 %v1588_v22 }
  0x54   :  { %1150 = vmatprep.subr.bf16.mxu0 %v1470_v0  ;;  %1174 = vmatprep.subr.bf16.mxu1 %v1470_v0 }
  0x57   :  { %1152 = vmatpush3.bf16.msra.mxu0 %v1594_v25  ;;  %1176 = vmatpush3.bf16.msra.mxu1 %v1594_v25 }
  0x58   :  { %1177 = vmatprep.subr.bf16.mxu0 %v1470_v0  ;;  %1201 = vmatprep.subr.bf16.mxu1 %v1470_v0 }
  0x5a   :  { %882 = vmatmul.mubr.f32.vlgmr.msra.gmra.mrb[0].mxu0 %v73_v26 }
  0x5b   :  { %1179 = vmatpush3.bf16.msra.mxu0 %v1555_v5  ;;  %951 = vmatprep.mubr.msk.f32.mxu0 %vm1471_vm0, %v1472_v1 }
  0x5c   :  { %1180 = vmatprep.subr.bf16.mxu0 %v1470_v0 }
  0x5f   :  { %1182 = vmatpush3.bf16.msra.mxu0 %v1558_v7 }
  0x60   :  { %1183 = vmatprep.subr.bf16.mxu0 %v1470_v0 }
  0x63   :  { %1185 = vmatpush3.bf16.msra.mxu0 %v1564_v10 }
  0x64   :  { %1186 = vmatprep.subr.bf16.mxu0 %v1470_v0 }
  0x67   :  { %1188 = vmatpush3.bf16.msra.mxu0 %v1570_v13 }
  0x68   :  { %1189 = vmatprep.subr.bf16.mxu0 %v1470_v0 }
  0x6b   :  { %1191 = vmatpush3.bf16.msra.mxu0 %v1576_v16 }
  0x6c   :  { %1192 = vmatprep.subr.bf16.mxu0 %v1470_v0 }
  0x6f   :  { %1194 = vmatpush3.bf16.msra.mxu0 %v1582_v19 }
  0x70   :  { %1195 = vmatprep.subr.bf16.mxu0 %v1470_v0 }
  0x73   :  { %1197 = vmatpush3.bf16.msra.mxu0 %v1588_v22 }
  0x74   :  { %1198 = vmatprep.subr.bf16.mxu0 %v1470_v0 }
  0x77   :  { %1200 = vmatpush3.bf16.msra.mxu0 %v1594_v25 }
  0x78   :  { %1225 = vmatprep.subr.bf16.mxu0 %v1470_v0 }
 0x12d   :  { %v141_v28 = vpop.f32.mrb[0].mxu0 }
 0x12e   :  { %v145_v29 = vadd.f32 %v141_v28, %v74_v27  ;;  %v883_v30 = vpop.f32.mrb[1].mxu0 }
 0x130   :  { %1331 = vtanh.f32 %v145_v29 }
 0x13a   :  { %v1332_v31 = vpop.eup %1331 }
 0x13b   :  { %147 = vst [vmem:[#allocation8] sm:$0xff] %v1332_v31  ;;  %917 = vmatmul.mubr.f32.vlgmr.msra.gmra.mrb[0].mxu1 %v1332_v31 }
 0x13c   :  { %1203 = vmatpush3.bf16.msra.mxu1 %v1555_v5  ;;  %986 = vmatprep.mubr.msk.f32.mxu1 %vm1471_vm0, %v1472_v1 }
 0x13d   :  { %1204 = vmatprep.subr.bf16.mxu1 %v1470_v0 }
 0x140   :  { %1206 = vmatpush3.bf16.msra.mxu1 %v1558_v7 }
 0x141   :  { %1207 = vmatprep.subr.bf16.mxu1 %v1470_v0 }
 0x144   :  { %1209 = vmatpush3.bf16.msra.mxu1 %v1564_v10 }
 0x145   :  { %1210 = vmatprep.subr.bf16.mxu1 %v1470_v0 }
 0x148   :  { %1212 = vmatpush3.bf16.msra.mxu1 %v1570_v13 }
 0x149   :  { %1213 = vmatprep.subr.bf16.mxu1 %v1470_v0 }
 0x14c   :  { %1215 = vmatpush3.bf16.msra.mxu1 %v1576_v16 }
 0x14d   :  { %1216 = vmatprep.subr.bf16.mxu1 %v1470_v0 }
 0x150   :  { %1218 = vmatpush3.bf16.msra.mxu1 %v1582_v19 }
 0x151   :  { %1219 = vmatprep.subr.bf16.mxu1 %v1470_v0 }
 0x154   :  { %1221 = vmatpush3.bf16.msra.mxu1 %v1588_v22 }
 0x155   :  { %1222 = vmatprep.subr.bf16.mxu1 %v1470_v0 }
 0x158   :  { %1224 = vmatpush3.bf16.msra.mxu1 %v1594_v25 }
 0x159   :  { %1249 = vmatprep.subr.bf16.mxu1 %v1470_v0 }
 0x20e   :  { %v216_v33 = vpop.f32.mrb[0].mxu1 }
 0x20f   :  { %v220_v34 = vadd.f32 %v216_v33, %v149_v32  ;;  %v918_v35 = vpop.f32.mrb[1].mxu1 }
 0x211   :  { %1333 = vtanh.f32 %v220_v34 }
 0x21b   :  { %v1334_v36 = vpop.eup %1333 }
 0x21c   :  { %223 = vst [vmem:[#allocation8 + $0x8] sm:$0xff] %v1334_v36  ;;  %952 = vmatmul.mubr.f32.vlgmr.msra.gmra.mrb[2].mxu0 %v1334_v36 }
 0x21d   :  { %1227 = vmatpush3.bf16.msra.mxu0 %v1555_v5  ;;  %1021 = vmatprep.mubr.msk.f32.mxu0 %vm1471_vm0, %v1472_v1 }
 0x21e   :  { %1228 = vmatprep.subr.bf16.mxu0 %v1470_v0 }
 0x221   :  { %1230 = vmatpush3.bf16.msra.mxu0 %v1558_v7 }
 0x222   :  { %1231 = vmatprep.subr.bf16.mxu0 %v1470_v0 }
 0x225   :  { %1233 = vmatpush3.bf16.msra.mxu0 %v1564_v10 }
 0x226   :  { %1234 = vmatprep.subr.bf16.mxu0 %v1470_v0 }
 0x229   :  { %1236 = vmatpush3.bf16.msra.mxu0 %v1570_v13 }
 0x22a   :  { %1237 = vmatprep.subr.bf16.mxu0 %v1470_v0 }
 0x22d   :  { %1239 = vmatpush3.bf16.msra.mxu0 %v1576_v16 }
 0x22e   :  { %1240 = vmatprep.subr.bf16.mxu0 %v1470_v0 }
 0x231   :  { %1242 = vmatpush3.bf16.msra.mxu0 %v1582_v19 }
 0x232   :  { %1243 = vmatprep.subr.bf16.mxu0 %v1470_v0 }
 0x235   :  { %1245 = vmatpush3.bf16.msra.mxu0 %v1588_v22 }
 0x236   :  { %1246 = vmatprep.subr.bf16.mxu0 %v1470_v0 }
 0x239   :  { %1248 = vmatpush3.bf16.msra.mxu0 %v1594_v25 }
 0x23a   :  { %1273 = vmatprep.subr.bf16.mxu0 %v1470_v0 }
 0x2ef   :  { %v292_v38 = vpop.f32.mrb[2].mxu0 }
 0x2f0   :  { %v296_v39 = vadd.f32 %v292_v38, %v225_v37  ;;  %v953_v40 = vpop.f32.mrb[3].mxu0 }
 0x2f2   :  { %1335 = vtanh.f32 %v296_v39 }
 0x2fc   :  { %v1336_v41 = vpop.eup %1335 }
 0x2fd   :  { %299 = vst [vmem:[#allocation8 + $0x10] sm:$0xff] %v1336_v41  ;;  %987 = vmatmul.mubr.f32.vlgmr.msra.gmra.mrb[2].mxu1 %v1336_v41 }
 0x2fe   :  { %1251 = vmatpush3.bf16.msra.mxu1 %v1555_v5  ;;  %1056 = vmatprep.mubr.msk.f32.mxu1 %vm1471_vm0, %v1472_v1 }
 0x2ff   :  { %1252 = vmatprep.subr.bf16.mxu1 %v1470_v0 }
 0x302   :  { %1254 = vmatpush3.bf16.msra.mxu1 %v1558_v7 }
 0x303   :  { %1255 = vmatprep.subr.bf16.mxu1 %v1470_v0 }
 0x306   :  { %1257 = vmatpush3.bf16.msra.mxu1 %v1564_v10 }
 0x307   :  { %1258 = vmatprep.subr.bf16.mxu1 %v1470_v0 }
 0x30a   :  { %1260 = vmatpush3.bf16.msra.mxu1 %v1570_v13 }
 0x30b   :  { %1261 = vmatprep.subr.bf16.mxu1 %v1470_v0 }
 0x30e   :  { %1263 = vmatpush3.bf16.msra.mxu1 %v1576_v16 }
 0x30f   :  { %1264 = vmatprep.subr.bf16.mxu1 %v1470_v0 }
 0x312   :  { %1266 = vmatpush3.bf16.msra.mxu1 %v1582_v19 }
 0x313   :  { %1267 = vmatprep.subr.bf16.mxu1 %v1470_v0 }
 0x316   :  { %1269 = vmatpush3.bf16.msra.mxu1 %v1588_v22 }
 0x317   :  { %1270 = vmatprep.subr.bf16.mxu1 %v1470_v0 }
 0x31a   :  { %1272 = vmatpush3.bf16.msra.mxu1 %v1594_v25 }
 0x31b   :  { %1297 = vmatprep.subr.bf16.mxu1 %v1470_v0 }
 0x3d0   :  { %v368_v43 = vpop.f32.mrb[2].mxu1 }
 0x3d1   :  { %v372_v44 = vadd.f32 %v368_v43, %v301_v42  ;;  %v988_v45 = vpop.f32.mrb[3].mxu1 }
 0x3d3   :  { %1337 = vtanh.f32 %v372_v44 }
 0x3dd   :  { %v1338_v46 = vpop.eup %1337 }
 0x3de   :  { %375 = vst [vmem:[#allocation8 + $0x18] sm:$0xff] %v1338_v46  ;;  %1022 = vmatmul.mubr.f32.vlgmr.msra.gmra.mrb[4].mxu0 %v1338_v46 }
 0x3df   :  { %1275 = vmatpush3.bf16.msra.mxu0 %v1555_v5  ;;  %1091 = vmatprep.mubr.msk.f32.mxu0 %vm1471_vm0, %v1472_v1 }
 0x3e0   :  { %1276 = vmatprep.subr.bf16.mxu0 %v1470_v0 }
 0x3e3   :  { %1278 = vmatpush3.bf16.msra.mxu0 %v1558_v7 }
 0x3e4   :  { %1279 = vmatprep.subr.bf16.mxu0 %v1470_v0 }
 0x3e7   :  { %1281 = vmatpush3.bf16.msra.mxu0 %v1564_v10 }
 0x3e8   :  { %1282 = vmatprep.subr.bf16.mxu0 %v1470_v0 }
 0x3eb   :  { %1284 = vmatpush3.bf16.msra.mxu0 %v1570_v13 }
 0x3ec   :  { %1285 = vmatprep.subr.bf16.mxu0 %v1470_v0 }
 0x3ef   :  { %1287 = vmatpush3.bf16.msra.mxu0 %v1576_v16 }
 0x3f0   :  { %1288 = vmatprep.subr.bf16.mxu0 %v1470_v0 }
 0x3f3   :  { %1290 = vmatpush3.bf16.msra.mxu0 %v1582_v19 }
 0x3f4   :  { %1291 = vmatprep.subr.bf16.mxu0 %v1470_v0 }
 0x3f7   :  { %1293 = vmatpush3.bf16.msra.mxu0 %v1588_v22 }
 0x3f8   :  { %1294 = vmatprep.subr.bf16.mxu0 %v1470_v0 }
 0x3fb   :  { %1296 = vmatpush3.bf16.msra.mxu0 %v1594_v25 }
 0x4b1   :  { %v444_v48 = vpop.f32.mrb[4].mxu0 }
 0x4b2   :  { %v448_v49 = vadd.f32 %v444_v48, %v377_v47  ;;  %v1023_v50 = vpop.f32.mrb[5].mxu0 }
 0x4b4   :  { %1339 = vtanh.f32 %v448_v49 }
 0x4be   :  { %v1340_v51 = vpop.eup %1339 }
 0x4bf   :  { %451 = vst [vmem:[#allocation8 + $0x20] sm:$0xff] %v1340_v51  ;;  %1057 = vmatmul.mubr.f32.vlgmr.msra.gmra.mrb[4].mxu1 %v1340_v51 }
 0x4c0   :  { %1299 = vmatpush3.bf16.msra.mxu1 %v1555_v5  ;;  %1126 = vmatprep.mubr.msk.f32.mxu1 %vm1471_vm0, %v1472_v1 }
 0x4c1   :  { %1300 = vmatprep.subr.bf16.mxu1 %v1470_v0 }
 0x4c4   :  { %1302 = vmatpush3.bf16.msra.mxu1 %v1558_v7 }
 0x4c5   :  { %1303 = vmatprep.subr.bf16.mxu1 %v1470_v0 }
 0x4c8   :  { %1305 = vmatpush3.bf16.msra.mxu1 %v1564_v10 }
 0x4c9   :  { %1306 = vmatprep.subr.bf16.mxu1 %v1470_v0 }
 0x4cc   :  { %1308 = vmatpush3.bf16.msra.mxu1 %v1570_v13 }
 0x4cd   :  { %1309 = vmatprep.subr.bf16.mxu1 %v1470_v0 }
 0x4d0   :  { %1311 = vmatpush3.bf16.msra.mxu1 %v1576_v16 }
 0x4d1   :  { %1312 = vmatprep.subr.bf16.mxu1 %v1470_v0 }
 0x4d4   :  { %1314 = vmatpush3.bf16.msra.mxu1 %v1582_v19 }
 0x4d5   :  { %1315 = vmatprep.subr.bf16.mxu1 %v1470_v0 }
 0x4d8   :  { %1317 = vmatpush3.bf16.msra.mxu1 %v1588_v22 }
 0x4d9   :  { %1318 = vmatprep.subr.bf16.mxu1 %v1470_v0 }
 0x4dc   :  { %1320 = vmatpush3.bf16.msra.mxu1 %v1594_v25 }
 0x592   :  { %v520_v53 = vpop.f32.mrb[4].mxu1 }
 0x593   :  { %v524_v54 = vadd.f32 %v520_v53, %v453_v52  ;;  %v1058_v55 = vpop.f32.mrb[5].mxu1 }
 0x595   :  { %1341 = vtanh.f32 %v524_v54 }
 0x59f   :  { %v1342_v56 = vpop.eup %1341 }
 0x5a0   :  { %527 = vst [vmem:[#allocation8 + $0x28] sm:$0xff] %v1342_v56  ;;  %1092 = vmatmul.mubr.f32.vlgmr.msra.gmra.mrb[6].mxu0 %v1342_v56 }
 0x673   :  { %v596_v58 = vpop.f32.mrb[6].mxu0 }
 0x674   :  { %v600_v59 = vadd.f32 %v596_v58, %v529_v57  ;;  %v1093_v60 = vpop.f32.mrb[7].mxu0 }
 0x676   :  { %1343 = vtanh.f32 %v600_v59 }
 0x680   :  { %v1344_v61 = vpop.eup %1343 }
 0x681   :  { %603 = vst [vmem:[#allocation8 + $0x30] sm:$0xff] %v1344_v61  ;;  %1127 = vmatmul.mubr.f32.vlgmr.msra.gmra.mrb[6].mxu1 %v1344_v61 }
 0x754   :  { %v672_v63 = vpop.f32.mrb[6].mxu1 }
 0x755   :  { %v676_v0 = vadd.f32 %v672_v63, %v605_v62  ;;  %v1128_v1 = vpop.f32.mrb[7].mxu1 }
 0x757   :  { %1345 = vtanh.f32 %v676_v0 }
 0x761   :  { %v1346_v2 = vpop.eup %1345 }
 0x762   :  { %679 = vst [vmem:[#allocation8 + $0x38] sm:$0xff] %v1346_v2  ;;  %680 = vst [vmem:[#allocation9] sm:$0xff] %v1346_v2 }
 0x763   :  { %1424 = shalt.err (!%p1421_p0)
}
 0x764   :  { %s1425_s7 = scalar_lea.hbm %s1739_s3, 1024 }
 0x765   :  { %p1426_p1 = scmp.ne.s32.totalorder %s1739_s3, %s1425_s7  ;;  %p1429_p2 = scmp.lt.u32.totalorder %s1425_s7, %s1739_s3 }
 0x767   :  { %p1431_p3 = pnand %p1429_p2, %p1426_p1 }
 0x769   :  { %1434 = shalt.err (!%p1431_p3)
}
 0x76a   :  { %692 = dma.vmem_to_hbm [thread:$0]  %s687_s25, 1024, %s1739_s3, [#allocation4], %s1467_s27, %s1467_s27, %s1468_s28  }
 0x76b   :  { %s1435_s13 = scalar_lea.vmem %s700_s29, 128  ;;  %p1440_p5 = scmp.lt.s32.totalorder %s700_s29, %s700_s29 }
 0x76c   :  { %p1436_p4 = scmp.ne.s32.totalorder %s700_s29, %s1435_s13  ;;  %p1441_p6 = scmp.lt.s32.totalorder %s1435_s13, %s1435_s13 }
 0x76e   :  { %p1442_p7 = por %p1441_p6, %p1440_p5 }
 0x770   :  { %p1443_p8 = pnand %p1442_p7, %p1436_p4 }
 0x772   :  { %1446 = shalt.err (!%p1443_p8)
}
 0x773   :  { %s1447_s16 = scalar_lea.hbm %s1740_s4, 128 }
 0x774   :  { %p1448_p9 = scmp.ne.s32.totalorder %s1740_s4, %s1447_s16  ;;  %p1451_p10 = scmp.lt.u32.totalorder %s1447_s16, %s1740_s4 }
 0x776   :  { %p1453_p11 = pnand %p1451_p10, %p1448_p9 }
 0x778   :  { %1456 = shalt.err (!%p1453_p11)
}
 0x779   :  { %702 = dma.vmem_to_hbm [thread:$0]  %s700_s29, 128, %s1740_s4, [#allocation10]  }
 0x77a   :  { %1461 = dma.done.wait [#allocation4], 1024  }
 0x77b   :  { %1462 = vsyncadd [#allocation4], 4294966272 }
 0x77c   :  { %1463 = dma.done.wait [#allocation10], 128  }
 0x77d   :  { %1464 = vsyncadd [#allocation10], 4294967168 }
 0x77e   :  { %709 = vsyncpa [#allocation3], 1 }
 0x77f   :  { %710 = vsyncpa [#allocation6], 1 }
 0x780   :  { %711 = vsyncpa [#allocation4], 1 }
 0x781   :  { %712 = vsyncpa [#allocation10], 1 }

</bundles_post_ra>
